<compile_context>
chip_gen: v7x
topology: tpu7x:2x2x1
jax: 0.10.0
libtpu: 0.0.40
codegen_flags: <defaults>
</compile_context>

<pallas_src>
import numpy as np
import jax
import jax.numpy as jnp
from jax import lax
from jax.experimental import pallas as pl
from jax.experimental.pallas import tpu as pltpu

# ---------------- hyper-parameters (mirror SwitchForward.__init__) -----------
T = 2          # t
PD = 4         # Pd  (perfect square, as required by vect())
PX = 4         # Px  (perfect square, as required by square())
NN = 8         # N
MM = 8         # M   (N == M keeps conv spatial size constant)
W_K = 3        # w   (conv kernel size)
ALPHA = 4      # alpha (conv channels)
L = 1          # number of middle conv layers
NS = 2         # batch size (Nsample)
PAD = int((NN - MM + W_K) / 2 - 0.5)   # same formula as the PyTorch module


# ----------------------- host-side weight folding (once) ----------------------
def _conv_matrix(w_np, H, W, pad):
    """Dense matrix M s.t. flatten(conv2d(x, w, pad)) = flatten(x) @ M.

    Input flat index  = (ci*H + ii)*W + jj   (NCHW, row-major).
    Output flat index = (co*Ho + oi)*Wo + oj.
    Padding is folded in (out-of-range taps simply contribute nothing).
    """
    cout, cin, kh, kw = w_np.shape
    Ho = H + 2 * pad - kh + 1
    Wo = W + 2 * pad - kw + 1
    M = np.zeros((cin * H * W, cout * Ho * Wo), np.float64)
    for co in range(cout):
        for ci in range(cin):
            for ki in range(kh):
                for kj in range(kw):
                    wv = float(w_np[co, ci, ki, kj])
                    for oi in range(Ho):
                        ii = oi + ki - pad
                        if ii < 0 or ii >= H:
                            continue
                        for oj in range(Wo):
                            jj = oj + kj - pad
                            if jj < 0 or jj >= W:
                                continue
                            M[(ci * H + ii) * W + jj,
                              (co * Ho + oi) * Wo + oj] += wv
    return M, Ho, Wo


def _block_diag(w_np):
    """(P, Cin, Cout) -> block-diagonal (P*Cin, P*Cout)."""
    P, cin, cout = w_np.shape
    M = np.zeros((P * cin, P * cout), np.float64)
    for p in range(P):
        M[p * cin:(p + 1) * cin, p * cout:(p + 1) * cout] = w_np[p]
    return M


def _complex_stack(Wr, Wi, br, bi):
    """[xr|xi] @ [[Wr, Wi], [-Wi, Wr]] + [br-bi | br+bi]  == complex op."""
    top = np.concatenate([Wr, Wi], axis=1)
    bot = np.concatenate([-Wi, Wr], axis=1)
    W = np.concatenate([top, bot], axis=0).astype(np.float64)
    b = np.concatenate([br - bi, br + bi]).astype(np.float64)
    return W, b


def _permute_cols_stacked(W, b, perm):
    """Fold `out_new[q] = out_old[perm[q]]` (per real/imag half) into W, b."""
    half = W.shape[1] // 2
    full = np.concatenate([perm, perm + half])
    return W[:, full], b[full]


def _vect_perm(n, P):
    s = int(np.sqrt(P))
    idx = np.arange(n * n).reshape(n, n)
    return idx.reshape(s, n // s, s, n // s).transpose(0, 2, 1, 3).reshape(-1)


def _switch_perm():
    return np.arange(PX * PD * T).reshape(PX, PD, T).transpose(1, 0, 2).reshape(-1)


def _square_perm(n, P):
    s = int(np.sqrt(P))
    return np.arange(n * n).reshape(s, s, n // s, n // s).transpose(0, 2, 1, 3).reshape(-1)


def build_fused_layers(params, weight_dtype=jnp.bfloat16):
    """Fold the module into a minimal list of (W, b, relu) stacked-real stages.

    Stages after folding:
      0: conv0 (complex, padding baked in)                     + ReLU
      1: conv1 (complex, padding baked in)                     + ReLU
      2: conv2 . vect . U-blockdiag . switch . V-blockdiag . square   (no ReLU)
    The ReLU-free tail (stage 2) is a single pre-multiplied affine map; this is
    valid only because there is no activation between those three sub-stages.
    """
    raw = []   # [W (f64), b (f64), relu]
    h = w = MM
    ncnn = len(params['cnn'])
    for i, (wr, wi, br, bi) in enumerate(params['cnn']):
        wr_np = np.asarray(wr, dtype=np.float64)
        wi_np = np.asarray(wi, dtype=np.float64)
        br_np = np.asarray(br, dtype=np.float64)
        bi_np = np.asarray(bi, dtype=np.float64)
        Mr, ho, wo = _conv_matrix(wr_np, h, w, PAD)
        Mi, _, _ = _conv_matrix(wi_np, h, w, PAD)
        br_full = np.repeat(br_np, ho * wo)
        bi_full = np.repeat(bi_np, ho * wo)
        Ws, bs = _complex_stack(Mr, Mi, br_full, bi_full)
        relu = i < ncnn - 1                     # ComplexReLU after first L+1 convs
        if i == ncnn - 1:
            # final conv has cout == 1 -> fold the vect() permutation into its
            # output columns (applied separately to the real / imag halves).
            Ws, bs = _permute_cols_stacked(Ws, bs, _vect_perm(ho, PD))
        raw.append([Ws, bs, relu])
        h, w = ho, wo

    # U stage: Pd block-diagonal ComplexLinears, switch permutation folded in.
    wur, wui, bur, bui = params['u']
    Wu, bu = _complex_stack(_block_diag(np.asarray(wur, dtype=np.float64)),
                            _block_diag(np.asarray(wui, dtype=np.float64)),
                            np.asarray(bur, dtype=np.float64).reshape(-1),
                            np.asarray(bui, dtype=np.float64).reshape(-1))
    Wu, bu = _permute_cols_stacked(Wu, bu, _switch_perm())
    raw.append([Wu, bu, False])

    # V stage: Px block-diagonal ComplexLinears, square permutation folded in.
    wvr, wvi, bvr, bvi = params['v']
    Wv, bv = _complex_stack(_block_diag(np.asarray(wvr, dtype=np.float64)),
                            _block_diag(np.asarray(wvi, dtype=np.float64)),
                            np.asarray(bvr, dtype=np.float64).reshape(-1),
                            np.asarray(bvi, dtype=np.float64).reshape(-1))
    Wv, bv = _permute_cols_stacked(Wv, bv, _square_perm(NN, PX))
    raw.append([Wv, bv, False])

    # ---- fold the ReLU-free tail: (x@W1+b1)@W2+b2 == x@(W1@W2)+(b1@W2+b2) ----
    # Folding layer k into k+1 requires layer k to have NO ReLU after it.
    while len(raw) > 1 and not raw[-2][2]:
        W2, b2, r2 = raw.pop()
        W1, b1, _ = raw.pop()
        raw.append([W1 @ W2, b1 @ W2 + b2, r2])

    # bf16 weights (MXU-native, halves weight DMA); f32 biases (added on the
    # f32 accumulator inside the kernel).
    layers = []
    for W, b, r in raw:
        layers.append((jnp.asarray(W.astype(np.float32)).astype(weight_dtype),
                       jnp.asarray(b.astype(np.float32)).reshape(1, -1),
                       r))
    return layers


# ------------------------------ fused Pallas kernel ----------------------------
def _make_fused_kernel(relu_flags):
    n_layers = len(relu_flags)

    def kernel(*refs):
        x_ref = refs[0]
        out_ref = refs[1 + 2 * n_layers]
        h = x_ref[...]                                   # (TB, 128) bf16, lane-dense
        for li in range(n_layers):
            w = refs[1 + 2 * li][...]                    # bf16 weights -> 1 MXU pass
            b = refs[2 + 2 * li][...]                    # f32 bias
            acc = jnp.dot(h, w, preferred_element_type=jnp.float32) + b
            if relu_flags[li]:
                acc = jnp.maximum(acc, 0.0)
            # Downcast for the next MXU pass only AFTER the f32 bias/ReLU
            # (v5e's VPU has no bf16); the final stage stays f32.
            h = acc.astype(jnp.bfloat16) if li < n_layers - 1 else acc
        out_ref[...] = h.astype(out_ref.dtype)           # (TB, 128) f32, lane-dense

    return kernel


def switch_forward_fused(xr, xi, fused_layers):
    ns = xr.shape[0]
    x_stack = jnp.concatenate(
        [xr.reshape(ns, -1), xi.reshape(ns, -1)], axis=1).astype(jnp.bfloat16)
    in_dim = x_stack.shape[1]
    out_dim = fused_layers[-1][0].shape[1]
    relu_flags = tuple(r for (_, _, r) in fused_layers)

    args = [x_stack]
    for W, b, _ in fused_layers:
        args.append(W)
        args.append(b)

    # Batch tile: whole (tiny) batch in one grid step today.  When Nsample
    # grows, pick TB as a multiple of 256 (v6e/v7x MXU) / 128 (v5e).
    TB = ns if ns <= 256 else 256
    assert ns % TB == 0
    grid = (pl.cdiv(ns, TB),)

    in_specs = [pl.BlockSpec((TB, in_dim), lambda i: (i, 0))]
    for W, b, _ in fused_layers:
        # Constant block index -> weights/biases stay VMEM-resident across the
        # batch grid (no per-step re-DMA).
        in_specs.append(pl.BlockSpec(W.shape, lambda i: (0, 0)))
        in_specs.append(pl.BlockSpec(b.shape, lambda i: (0, 0)))
    out_specs = pl.BlockSpec((TB, out_dim), lambda i: (i, 0))

    flops = 2 * ns * sum(int(W.shape[0]) * int(W.shape[1])
                         for W, _, _ in fused_layers)
    bytes_accessed = (sum(int(W.size) * W.dtype.itemsize +
                          int(b.size) * b.dtype.itemsize
                          for W, b, _ in fused_layers)
                      + int(x_stack.size) * x_stack.dtype.itemsize
                      + ns * out_dim * 4)

    out = pl.pallas_call(
        _make_fused_kernel(relu_flags),
        out_shape=jax.ShapeDtypeStruct((ns, out_dim), jnp.float32),
        grid=grid,
        in_specs=in_specs,
        out_specs=out_specs,
        compiler_params=pltpu.CompilerParams(
            dimension_semantics=("parallel",)),   # batch axis -> megacore / v7x 2-TC
        cost_estimate=pl.CostEstimate(
            flops=flops, transcendentals=0, bytes_accessed=bytes_accessed),
    )(*args)

    half = out_dim // 2
    n_out = int(np.sqrt(half))
    yr = out[:, :half].reshape(ns, n_out, n_out)
    yi = out[:, half:].reshape(ns, n_out, n_out)
    return yr, yi


# -------------------------- deterministic parameters --------------------------
def init_params(key):
    keys = iter(jax.random.split(key, 32))

    def nrm(shape, scale=0.1):
        return scale * jax.random.normal(next(keys), shape, dtype=jnp.float32)

    cnn = []
    cnn.append((nrm((ALPHA, 1, W_K, W_K)), nrm((ALPHA, 1, W_K, W_K)),
                nrm((ALPHA,)), nrm((ALPHA,))))
    for _ in range(L):
        cnn.append((nrm((ALPHA, ALPHA, W_K, W_K)), nrm((ALPHA, ALPHA, W_K, W_K)),
                    nrm((ALPHA,)), nrm((ALPHA,))))
    cnn.append((nrm((1, ALPHA, W_K, W_K)), nrm((1, ALPHA, W_K, W_K)),
                nrm((1,)), nrm((1,))))

    cols_u = (MM * MM) // PD
    u = (nrm((PD, cols_u, T * PX)), nrm((PD, cols_u, T * PX)),
         nrm((PD, T * PX)), nrm((PD, T * PX)))
    cols_v = T * PD
    v = (nrm((PX, cols_v, (NN * NN) // PX)), nrm((PX, cols_v, (NN * NN) // PX)),
         nrm((PX, (NN * NN) // PX)), nrm((PX, (NN * NN) // PX)))
    return {'cnn': cnn, 'u': u, 'v': v}


# ----------------------------- pure-JAX reference ------------------------------
def vect(z, P):
    ns, n, _ = z.shape
    s = int(np.sqrt(P))
    y = z.reshape(ns, s, n // s, s, n // s)
    y = jnp.transpose(y, (0, 1, 3, 2, 4))
    return y.reshape(ns, n * n)


def square(z, P):
    ns, n2 = z.shape
    n = int(np.sqrt(n2))
    s = int(np.sqrt(P))
    y = z.reshape(ns, s, s, n // s, n // s)
    y = jnp.transpose(y, (0, 1, 3, 2, 4))
    return y.reshape(ns, n, n)


def switch_permute(u):
    ns = u.shape[0]
    u = u.reshape(ns, PD * T * PX)
    u = u.reshape(ns, PX, PD, T)
    u = jnp.transpose(u, (0, 2, 1, 3))
    u = u.reshape(ns, PD * PX * T)
    return u.reshape(ns, PX, T * PD)


def ref_forward(xr, xi, params):
    def conv(x, w, b):
        y = lax.conv_general_dilated(x, w, (1, 1), [(PAD, PAD), (PAD, PAD)],
                                     dimension_numbers=('NCHW', 'OIHW', 'NCHW'))
        return y + b[None, :, None, None]

    dr, di = xr[:, None], xi[:, None]
    for i in range(L + 1):
        wr, wi, br, bi = params['cnn'][i]
        nr = conv(dr, wr, br) - conv(di, wi, bi)
        ni = conv(di, wr, br) + conv(dr, wi, bi)
        dr, di = jnp.maximum(nr, 0.0), jnp.maximum(ni, 0.0)
    wr, wi, br, bi = params['cnn'][L + 1]
    nr = conv(dr, wr, br) - conv(di, wi, bi)
    ni = conv(di, wr, br) + conv(dr, wi, bi)
    dr, di = nr[:, 0], ni[:, 0]

    dr, di = vect(dr, PD), vect(di, PD)
    ns = dr.shape[0]
    zr = dr.reshape(ns, PD, -1)
    zi = di.reshape(ns, PD, -1)

    def blin(xr_, xi_, w):
        wr_, wi_, br_, bi_ = w
        rr = jnp.einsum('npc,pco->npo', xr_, wr_)
        ii = jnp.einsum('npc,pco->npo', xi_, wi_)
        ir = jnp.einsum('npc,pco->npo', xi_, wr_)
        ri = jnp.einsum('npc,pco->npo', xr_, wi_)
        return rr - ii + (br_ - bi_)[None], ir + ri + (br_ + bi_)[None]

    ur, ui = blin(zr, zi, params['u'])
    ur, ui = switch_permute(ur), switch_permute(ui)
    vr, vi = blin(ur, ui, params['v'])
    vr = vr.reshape(ns, NN * NN)
    vi = vi.reshape(ns, NN * NN)
    return square(vr, PX), square(vi, PX)


# ----------------------------------- main --------------------------------------
if __name__ == "__main__":
    key = jax.random.PRNGKey(0)
    kp, kxr, kxi = jax.random.split(key, 3)
    params = init_params(kp)
    fused_layers = build_fused_layers(params)   # host-side fold (incl. tail), once
    assert len(fused_layers) == 3               # conv0, conv1, fused ReLU-free tail

    # complex input x of shape (Nsample, M, M) as (real, imag) float32 planes
    xr = jax.random.normal(kxr, (NS, MM, MM), dtype=jnp.float32)
    xi = jax.random.normal(kxi, (NS, MM, MM), dtype=jnp.float32)

    yr, yi = switch_forward_fused(xr, xi, fused_layers)
    yr = jax.block_until_ready(yr)
    yi = jax.block_until_ready(yi)

    assert yr.shape == (NS, NN, NN) and yi.shape == (NS, NN, NN)
    ref_r, ref_i = ref_forward(xr, xi, params)
    # Tolerance relaxed vs. the f32 reference because weights/activations are
    # bf16 (f32 accumulation); still far tighter than any permutation/wiring
    # bug would produce (those shift values by O(0.1-0.3)).
    np.testing.assert_allclose(np.asarray(yr), np.asarray(ref_r), rtol=3e-2, atol=2e-2)
    np.testing.assert_allclose(np.asarray(yi), np.asarray(ref_i), rtol=3e-2, atol=2e-2)

    print("KERNEL_OK")
</pallas_src>

<mosaic_0001>
module attributes {stable_mosaic.version = 11 : i64} {
  func.func @kernel(%arg0: i32, %arg1: memref<2x128xbf16, #tpu.memory_space<vmem>>, %arg2: memref<128x512xbf16, #tpu.memory_space<vmem>>, %arg3: memref<1x512xf32, #tpu.memory_space<vmem>>, %arg4: memref<512x512xbf16, #tpu.memory_space<vmem>>, %arg5: memref<1x512xf32, #tpu.memory_space<vmem>>, %arg6: memref<512x128xbf16, #tpu.memory_space<vmem>>, %arg7: memref<1x128xf32, #tpu.memory_space<vmem>>, %arg8: memref<2x128xf32, #tpu.memory_space<vmem>>) attributes {dimension_semantics = [#tpu.dimension_semantics<parallel>], iteration_bounds = array<i64: 1>, scalar_prefetch = 0 : i64, scratch_operands = 0 : i64, tpu.core_type = #tpu.core_type<tc>, window_params = [{transform_indices = @transform_0, window_bounds = array<i64: 2, 128>}, {pipeline_mode = #tpu.pipeline_mode<synchronous>, transform_indices = @transform_1, window_bounds = array<i64: 128, 512>}, {pipeline_mode = #tpu.pipeline_mode<synchronous>, transform_indices = @transform_2, window_bounds = array<i64: 1, 512>}, {pipeline_mode = #tpu.pipeline_mode<synchronous>, transform_indices = @transform_3, window_bounds = array<i64: 512, 512>}, {pipeline_mode = #tpu.pipeline_mode<synchronous>, transform_indices = @transform_4, window_bounds = array<i64: 1, 512>}, {pipeline_mode = #tpu.pipeline_mode<synchronous>, transform_indices = @transform_5, window_bounds = array<i64: 512, 128>}, {pipeline_mode = #tpu.pipeline_mode<synchronous>, transform_indices = @transform_6, window_bounds = array<i64: 1, 128>}, {transform_indices = @transform_7, window_bounds = array<i64: 2, 128>}]} {
    %c0 = arith.constant 0 : index
    %c0_0 = arith.constant 0 : index
    %0 = vector.load %arg1[%c0, %c0_0] : memref<2x128xbf16, #tpu.memory_space<vmem>>, vector<2x128xbf16>
    %c0_1 = arith.constant 0 : index
    %c0_2 = arith.constant 0 : index
    %1 = vector.load %arg2[%c0_1, %c0_2] : memref<128x512xbf16, #tpu.memory_space<vmem>>, vector<128x512xbf16>
    %c0_3 = arith.constant 0 : index
    %c0_4 = arith.constant 0 : index
    %2 = vector.load %arg3[%c0_3, %c0_4] : memref<1x512xf32, #tpu.memory_space<vmem>>, vector<1x512xf32>
    %cst = arith.constant dense<0.000000e+00> : vector<2x512xf32>
    %3 = tpu.matmul %0, %1, %cst {dimension_numbers = #tpu.dot_dimension_numbers<[1], [0], [0], [1], [0, 0, 1, 1], [], []>} : vector<2x128xbf16>, vector<128x512xbf16>, vector<2x512xf32> -> vector<2x512xf32>
    %4 = vector.broadcast %2 : vector<1x512xf32> to vector<2x512xf32>
    %5 = arith.addf %3, %4 : vector<2x512xf32>
    %cst_5 = arith.constant 0.000000e+00 : f32
    %6 = vector.broadcast %cst_5 : f32 to vector<2x512xf32>
    %7 = arith.maximumf %5, %6 : vector<2x512xf32>
    %8 = arith.truncf %7 : vector<2x512xf32> to vector<2x512xbf16>
    %c0_6 = arith.constant 0 : index
    %c0_7 = arith.constant 0 : index
    %9 = vector.load %arg4[%c0_6, %c0_7] : memref<512x512xbf16, #tpu.memory_space<vmem>>, vector<512x512xbf16>
    %c0_8 = arith.constant 0 : index
    %c0_9 = arith.constant 0 : index
    %10 = vector.load %arg5[%c0_8, %c0_9] : memref<1x512xf32, #tpu.memory_space<vmem>>, vector<1x512xf32>
    %cst_10 = arith.constant dense<0.000000e+00> : vector<2x512xf32>
    %11 = tpu.matmul %8, %9, %cst_10 {dimension_numbers = #tpu.dot_dimension_numbers<[1], [0], [0], [1], [0, 0, 1, 1], [], []>} : vector<2x512xbf16>, vector<512x512xbf16>, vector<2x512xf32> -> vector<2x512xf32>
    %12 = vector.broadcast %10 : vector<1x512xf32> to vector<2x512xf32>
    %13 = arith.addf %11, %12 : vector<2x512xf32>
    %cst_11 = arith.constant 0.000000e+00 : f32
    %14 = vector.broadcast %cst_11 : f32 to vector<2x512xf32>
    %15 = arith.maximumf %13, %14 : vector<2x512xf32>
    %16 = arith.truncf %15 : vector<2x512xf32> to vector<2x512xbf16>
    %c0_12 = arith.constant 0 : index
    %c0_13 = arith.constant 0 : index
    %17 = vector.load %arg6[%c0_12, %c0_13] : memref<512x128xbf16, #tpu.memory_space<vmem>>, vector<512x128xbf16>
    %c0_14 = arith.constant 0 : index
    %c0_15 = arith.constant 0 : index
    %18 = vector.load %arg7[%c0_14, %c0_15] : memref<1x128xf32, #tpu.memory_space<vmem>>, vector<1x128xf32>
    %cst_16 = arith.constant dense<0.000000e+00> : vector<2x128xf32>
    %19 = tpu.matmul %16, %17, %cst_16 {dimension_numbers = #tpu.dot_dimension_numbers<[1], [0], [0], [1], [0, 0, 1, 1], [], []>} : vector<2x512xbf16>, vector<512x128xbf16>, vector<2x128xf32> -> vector<2x128xf32>
    %20 = vector.broadcast %18 : vector<1x128xf32> to vector<2x128xf32>
    %21 = arith.addf %19, %20 : vector<2x128xf32>
    %c0_17 = arith.constant 0 : index
    %c0_18 = arith.constant 0 : index
    %22 = vector.load %arg8[%c0_17, %c0_18] : memref<2x128xf32, #tpu.memory_space<vmem>>, vector<2x128xf32>
    tpu.vector_store %arg8[%c0_17, %c0_18], %21 {strides = array<i32>} : memref<2x128xf32, #tpu.memory_space<vmem>>, vector<2x128xf32>,
    return
  }
  func.func @transform_0(%arg0: i32) -> (i32, i32) {
    %c0_i32 = arith.constant 0 : i32
    %c0_i32_0 = arith.constant 0 : i32
    return %arg0, %c0_i32 : i32, i32
  }
  func.func @transform_1(%arg0: i32) -> (i32, i32) {
    %c0_i32 = arith.constant 0 : i32
    %c0_i32_0 = arith.constant 0 : i32
    %c0_i32_1 = arith.constant 0 : i32
    return %c0_i32, %c0_i32_0 : i32, i32
  }
  func.func @transform_2(%arg0: i32) -> (i32, i32) {
    %c0_i32 = arith.constant 0 : i32
    %c0_i32_0 = arith.constant 0 : i32
    %c0_i32_1 = arith.constant 0 : i32
    return %c0_i32, %c0_i32_0 : i32, i32
  }
  func.func @transform_3(%arg0: i32) -> (i32, i32) {
    %c0_i32 = arith.constant 0 : i32
    %c0_i32_0 = arith.constant 0 : i32
    %c0_i32_1 = arith.constant 0 : i32
    return %c0_i32, %c0_i32_0 : i32, i32
  }
  func.func @transform_4(%arg0: i32) -> (i32, i32) {
    %c0_i32 = arith.constant 0 : i32
    %c0_i32_0 = arith.constant 0 : i32
    %c0_i32_1 = arith.constant 0 : i32
    return %c0_i32, %c0_i32_0 : i32, i32
  }
  func.func @transform_5(%arg0: i32) -> (i32, i32) {
    %c0_i32 = arith.constant 0 : i32
    %c0_i32_0 = arith.constant 0 : i32
    %c0_i32_1 = arith.constant 0 : i32
    return %c0_i32, %c0_i32_0 : i32, i32
  }
  func.func @transform_6(%arg0: i32) -> (i32, i32) {
    %c0_i32 = arith.constant 0 : i32
    %c0_i32_0 = arith.constant 0 : i32
    %c0_i32_1 = arith.constant 0 : i32
    return %c0_i32, %c0_i32_0 : i32, i32
  }
  func.func @transform_7(%arg0: i32) -> (i32, i32) {
    %c0_i32 = arith.constant 0 : i32
    %c0_i32_0 = arith.constant 0 : i32
    return %arg0, %c0_i32 : i32, i32
  }
}

</mosaic_0001>

<bundles_post_ra>
// kernel: tpu_custom_call.1
= control target key start
LH: loop header
LB: loop body
LE: loop exit
PB: predicated region body
PF: predicated region fallthrough
CT: control target
= control target key end

     0   :  { %12 = vsyncpa [#allocation3], 0  ;;  %s2514_s0 = inlined_call_operand.hbm [shape: bf16[2,128], index: 0, kind: input, shape index: {}]   ;;  %s2515_s1 = inlined_call_operand.hbm [shape: bf16[128,512], index: 1, kind: input, shape index: {}]   ;;  %s2516_s2 = inlined_call_operand.vmem [shape: f32[1,512], index: 2, kind: input, shape index: {}]   ;;  %s2517_s3 = inlined_call_operand.hbm [shape: bf16[512,512], index: 3, kind: input, shape index: {}]   ;;  %s2518_s4 = inlined_call_operand.vmem [shape: f32[1,512], index: 4, kind: input, shape index: {}]   ;;  %s2519_s5 = inlined_call_operand.hbm [shape: bf16[512,128], index: 5, kind: input, shape index: {}]   ;;  %s2520_s6 = inlined_call_operand.vmem [shape: f32[1,128], index: 6, kind: input, shape index: {}]   ;;  %s2521_s7 = inlined_call_operand.hbm [shape: f32[2,128], index: 7, kind: output, shape index: {}]  }
   0x1   :  { %13 = vsyncpa [#allocation6], 0 }
   0x2   :  { %14 = vsyncpa [#allocation9], 0 }
   0x3   :  { %15 = vsyncpa [#allocation4], 0  ;;  %s2358_s24 = smov [#allocation5]   ;;  %s2240_s28 = scalar_lea.hbm %s2515_s1, 4096 }
   0x4   :  { %s31_s25 = sshll.u32 %s2358_s24, 4  ;;  %p2241_p0 = scmp.ne.s32.totalorder %s2515_s1, %s2240_s28  ;;  %s32_s25 = int_to_ptr.vmem [resolvable:$true] %s31_s25 }
   0x5   :  { %p2244_p1 = scmp.lt.u32.totalorder %s2240_s28, %s2515_s1 }
   0x7   :  { %p2246_p2 = pnand %p2244_p1, %p2241_p0 }
   0x9   :  { %2249 = shalt.err (!%p2246_p2)
}
   0xa   :  { %s2250_s10 = scalar_lea.vmem %s32_s25, 4096  ;;  %p2255_p4 = scmp.lt.s32.totalorder %s32_s25, %s32_s25 }
   0xb   :  { %p2251_p3 = scmp.ne.s32.totalorder %s32_s25, %s2250_s10  ;;  %p2256_p5 = scmp.lt.s32.totalorder %s2250_s10, %s2250_s10 }
   0xd   :  { %p2257_p6 = por %p2256_p5, %p2255_p4 }
   0xf   :  { %p2258_p7 = pnand %p2257_p6, %p2251_p3 }
  0x11   :  { %2261 = shalt.err (!%p2258_p7)
}
  0x12   :  { %s2359_s11 = smov 256   ;;  %s2360_s12 = smov 16  }
  0x13   :  { %37 = dma.hbm_to_vmem [thread:$0]  %s2515_s1, 4096, %s32_s25, [#allocation6], %s2359_s11, %s2359_s11, %s2360_s12  }
  0x14   :  { %s2361_s15 = smov [#allocation2]   ;;  %s2362_s17 = smov [#allocation7]  }
  0x15   :  { %s22_s16 = sshll.u32 %s2361_s15, 4  ;;  %s45_s18 = sshll.u32 %s2362_s17, 4  ;;  %s23_s16 = int_to_ptr.vmem [resolvable:$true] %s22_s16  ;;  %s46_s18 = int_to_ptr.vmem [resolvable:$true] %s45_s18 }
  0x16   :  { %s2262_s21 = scalar_lea.hbm %s2514_s0, 16 }
  0x17   :  { %p2263_p8 = scmp.ne.s32.totalorder %s2514_s0, %s2262_s21  ;;  %p2266_p9 = scmp.lt.u32.totalorder %s2262_s21, %s2514_s0 }
  0x19   :  { %p2268_p10 = pnand %p2266_p9, %p2263_p8 }
  0x1b   :  { %2271 = shalt.err (!%p2268_p10)
}
  0x1c   :  { %s2272_s1 = scalar_lea.vmem %s23_s16, 16  ;;  %s2276_s25 = scalar_lea.vmem %s23_s16, 32 }
  0x1d   :  { %p2273_p11 = scmp.ne.s32.totalorder %s23_s16, %s2272_s1  ;;  %p2277_p12 = scmp.lt.s32.totalorder %s23_s16, %s23_s16 }
  0x1e   :  { %p2278_p13 = scmp.lt.s32.totalorder %s2276_s25, %s2272_s1 }
  0x20   :  { %p2279_p0 = por %p2278_p13, %p2277_p12 }
  0x22   :  { %p2280_p1 = pnand %p2279_p0, %p2273_p11 }
  0x24   :  { %2283 = shalt.err (!%p2280_p1)
}
  0x25   :  { %25 = dma.hbm_to_vmem [thread:$0]  %s2514_s0, 16, %s23_s16, [#allocation3]  }
  0x26   :  { %s2284_s8 = scalar_lea.hbm %s2517_s3, 16384 }
  0x27   :  { %p2285_p2 = scmp.ne.s32.totalorder %s2517_s3, %s2284_s8  ;;  %p2288_p3 = scmp.lt.u32.totalorder %s2284_s8, %s2517_s3 }
  0x29   :  { %p2290_p4 = pnand %p2288_p3, %p2285_p2 }
  0x2b   :  { %2293 = shalt.err (!%p2290_p4)
}
  0x2c   :  { %s2294_s15 = scalar_lea.vmem %s46_s18, 16384  ;;  %p2299_p6 = scmp.lt.s32.totalorder %s46_s18, %s46_s18 }
  0x2d   :  { %p2295_p5 = scmp.ne.s32.totalorder %s46_s18, %s2294_s15  ;;  %p2300_p7 = scmp.lt.s32.totalorder %s2294_s15, %s2294_s15 }
  0x2f   :  { %p2301_p8 = por %p2300_p7, %p2299_p6 }
  0x31   :  { %p2302_p9 = pnand %p2301_p8, %p2295_p5 }
  0x33   :  { %2305 = shalt.err (!%p2302_p9)
}
  0x34   :  { %51 = dma.hbm_to_vmem [thread:$0]  %s2517_s3, 16384, %s46_s18, [#allocation6], %s2359_s11, %s2359_s11, %s2360_s12  }
  0x35   :  { %s2363_s17 = smov [#allocation8]   ;;  %s2306_s22 = scalar_lea.hbm %s2519_s5, 4096 }
  0x36   :  { %s59_s19 = sshll.u32 %s2363_s17, 4  ;;  %p2307_p10 = scmp.ne.s32.totalorder %s2519_s5, %s2306_s22  ;;  %s60_s19 = int_to_ptr.vmem [resolvable:$true] %s59_s19 }
  0x37   :  { %p2310_p11 = scmp.lt.u32.totalorder %s2306_s22, %s2519_s5 }
  0x39   :  { %p2312_p12 = pnand %p2310_p11, %p2307_p10 }
  0x3b   :  { %2315 = shalt.err (!%p2312_p12)
}
  0x3c   :  { %s2316_s25 = scalar_lea.vmem %s60_s19, 4096  ;;  %p2321_p0 = scmp.lt.s32.totalorder %s60_s19, %s60_s19 }
  0x3d   :  { %p2317_p13 = scmp.ne.s32.totalorder %s60_s19, %s2316_s25  ;;  %p2322_p1 = scmp.lt.s32.totalorder %s2316_s25, %s2316_s25 }
  0x3f   :  { %p2323_p2 = por %p2322_p1, %p2321_p0 }
  0x41   :  { %p2324_p3 = pnand %p2323_p2, %p2317_p13 }
  0x43   :  { %2327 = shalt.err (!%p2324_p3)
}
  0x44   :  { %s2364_s3 = smov 64   ;;  %s2365_s11 = smov 4  }
  0x45   :  { %65 = dma.hbm_to_vmem [thread:$0]  %s2519_s5, 4096, %s60_s19, [#allocation9], %s2364_s3, %s2364_s3, %s2365_s11  }
  0x46   :  { %2350 = dma.done.wait [#allocation3], 16  }
  0x47   :  { %2351 = vsyncadd [#allocation3], 4294967280 }
  0x48   :  { %2352 = dma.done.wait [#allocation6], 20480  }
  0x49   :  { %2353 = vsyncadd [#allocation6], 4294946816 }
  0x4a   :  { %2354 = dma.done.wait [#allocation9], 4096  }
  0x4b   :  { %2355 = vsyncadd [#allocation9], 4294963200  ;;  %v2366_v0 = vmov 0   ;;  %v1968_v1 = vld [vmem:[#allocation5 + $0x4] ss:$16 sps:$4 sm:$0xff]   ;;  %s2367_s30 = smov [#allocation10]  }
  0x4c   :  { %328 = vmatprep.mubr.bf16.mxu0 %v2366_v0  ;;  %369 = vmatprep.mubr.bf16.mxu1 %v2366_v0  ;;  %v1970_v2 = vld [vmem:[#allocation5] ss:$16 sps:$4 sm:$0xff]   ;;  %v1971_v3 = vld [vmem:[#allocation5 + $0x24] ss:$16 sps:$4 sm:$0xff]   ;;  %v1992_v10 = vld [vmem:[#allocation5 + $0xc] ss:$16 sps:$4 sm:$0xff]  }
  0x4d   :  { %296 = vmatprep.subr.bf16.mxu0 %v1968_v1  ;;  %v1973_v4 = vld [vmem:[#allocation5 + $0x20] ss:$16 sps:$4 sm:$0xff]   ;;  %v1974_v5 = vld [vmem:[#allocation5 + $0x44] ss:$16 sps:$4 sm:$0xff]   ;;  %v1994_v11 = vld [vmem:[#allocation5 + $0x8] ss:$16 sps:$4 sm:$0xff]   ;;  %337 = vmatprep.subr.bf16.mxu1 %v1992_v10 }
  0x4e   :  { %297 = vmatpush1.bf16.msra.mxu0 %v1970_v2  ;;  %v1976_v6 = vld [vmem:[#allocation5 + $0x40] ss:$16 sps:$4 sm:$0xff]   ;;  %v1977_v7 = vld [vmem:[#allocation5 + $0x64] ss:$16 sps:$4 sm:$0xff]   ;;  %v1995_v12 = vld [vmem:[#allocation5 + $0x2c] ss:$16 sps:$4 sm:$0xff]   ;;  %338 = vmatpush1.bf16.msra.mxu1 %v1994_v11 }
  0x4f   :  { %298 = vmatprep.subr.bf16.mxu0 %v1971_v3  ;;  %v1979_v8 = vld [vmem:[#allocation5 + $0x60] ss:$16 sps:$4 sm:$0xff]   ;;  %v1980_v9 = vld [vmem:[#allocation5 + $0x84] ss:$16 sps:$4 sm:$0xff]   ;;  %v1997_v14 = vld [vmem:[#allocation5 + $0x28] ss:$16 sps:$4 sm:$0xff]   ;;  %339 = vmatprep.subr.bf16.mxu1 %v1995_v12 }
  0x50   :  { %v1982_v13 = vld [vmem:[#allocation5 + $0x80] ss:$16 sps:$4 sm:$0xff]   ;;  %v1998_v15 = vld [vmem:[#allocation5 + $0x4c] ss:$16 sps:$4 sm:$0xff]   ;;  %v1983_v16 = vld [vmem:[#allocation5 + $0xa4] ss:$16 sps:$4 sm:$0xff]  }
  0x51   :  { %v1985_v17 = vld [vmem:[#allocation5 + $0xa0] ss:$16 sps:$4 sm:$0xff]   ;;  %v2000_v18 = vld [vmem:[#allocation5 + $0x48] ss:$16 sps:$4 sm:$0xff]   ;;  %v2001_v19 = vld [vmem:[#allocation5 + $0x6c] ss:$16 sps:$4 sm:$0xff]  }
  0x52   :  { %299 = vmatpush1.bf16.msra.mxu0 %v1973_v4  ;;  %340 = vmatpush1.bf16.msra.mxu1 %v1997_v14  ;;  %v1986_v20 = vld [vmem:[#allocation5 + $0xc4] ss:$16 sps:$4 sm:$0xff]   ;;  %v1988_v21 = vld [vmem:[#allocation5 + $0xc0] ss:$16 sps:$4 sm:$0xff]   ;;  %v2003_v22 = vld [vmem:[#allocation5 + $0x68] ss:$16 sps:$4 sm:$0xff]  }
  0x53   :  { %300 = vmatprep.subr.bf16.mxu0 %v1974_v5  ;;  %341 = vmatprep.subr.bf16.mxu1 %v1998_v15  ;;  %v2004_v23 = vld [vmem:[#allocation5 + $0x8c] ss:$16 sps:$4 sm:$0xff]   ;;  %v1989_v24 = vld [vmem:[#allocation5 + $0xe4] ss:$16 sps:$4 sm:$0xff]   ;;  %v1991_v25 = vld [vmem:[#allocation5 + $0xe0] ss:$16 sps:$4 sm:$0xff]  }
  0x54   :  { %v2006_v26 = vld [vmem:[#allocation5 + $0x88] ss:$16 sps:$4 sm:$0xff]   ;;  %v2007_v27 = vld [vmem:[#allocation5 + $0xac] ss:$16 sps:$4 sm:$0xff]   ;;  %v2018_v28 = vld [vmem:[#allocation7 + $0x4] ss:$16 sps:$4 sm:$0xff]  }
  0x55   :  { %v81_v29 = vld [vmem:[#allocation2] sm:$0x1]  ;;  %v2009_v30 = vld [vmem:[#allocation5 + $0xa8] ss:$16 sps:$4 sm:$0xff]   ;;  %v2016_v32 = vld [vmem:[#allocation7] ss:$16 sps:$4 sm:$0xff]  }
  0x56   :  { %301 = vmatpush1.bf16.msra.mxu0 %v1976_v6  ;;  %342 = vmatpush1.bf16.msra.mxu1 %v2000_v18  ;;  %v2010_v31 = vld [vmem:[#allocation5 + $0xcc] ss:$16 sps:$4 sm:$0xff]   ;;  %v2024_v33 = vld [vmem:[#allocation7 + $0x24] ss:$16 sps:$4 sm:$0xff]   ;;  %v2012_v34 = vld [vmem:[#allocation5 + $0xc8] ss:$16 sps:$4 sm:$0xff]  }
  0x57   :  { %302 = vmatprep.subr.bf16.mxu0 %v1977_v7  ;;  %343 = vmatprep.subr.bf16.mxu1 %v2001_v19  ;;  %v2013_v35 = vld [vmem:[#allocation5 + $0xec] ss:$16 sps:$4 sm:$0xff]   ;;  %v2022_v36 = vld [vmem:[#allocation7 + $0x20] ss:$16 sps:$4 sm:$0xff]   ;;  %v2030_v37 = vld [vmem:[#allocation7 + $0x44] ss:$16 sps:$4 sm:$0xff]  }
  0x58   :  { %v2015_v38 = vld [vmem:[#allocation5 + $0xe8] ss:$16 sps:$4 sm:$0xff]   ;;  %v2021_v39 = vld [vmem:[#allocation7 + $0xc] ss:$16 sps:$4 sm:$0xff]   ;;  %v2028_v40 = vld [vmem:[#allocation7 + $0x40] ss:$16 sps:$4 sm:$0xff]  }
  0x59   :  { %v2036_v41 = vld [vmem:[#allocation7 + $0x64] ss:$16 sps:$4 sm:$0xff]   ;;  %v2019_v42 = vld [vmem:[#allocation7 + $0x8] ss:$16 sps:$4 sm:$0xff]   ;;  %v2027_v43 = vld [vmem:[#allocation7 + $0x2c] ss:$16 sps:$4 sm:$0xff]  }
  0x5a   :  { %303 = vmatpush1.bf16.msra.mxu0 %v1979_v8  ;;  %344 = vmatpush1.bf16.msra.mxu1 %v2003_v22  ;;  %v2034_v44 = vld [vmem:[#allocation7 + $0x60] ss:$16 sps:$4 sm:$0xff]   ;;  %v2042_v45 = vld [vmem:[#allocation7 + $0x84] ss:$16 sps:$4 sm:$0xff]   ;;  %v2025_v46 = vld [vmem:[#allocation7 + $0x28] ss:$16 sps:$4 sm:$0xff]  }
  0x5b   :  { %304 = vmatprep.subr.bf16.mxu0 %v1980_v9  ;;  %345 = vmatprep.subr.bf16.mxu1 %v2004_v23  ;;  %v2033_v47 = vld [vmem:[#allocation7 + $0x4c] ss:$16 sps:$4 sm:$0xff]   ;;  %v2040_v48 = vld [vmem:[#allocation7 + $0x80] ss:$16 sps:$4 sm:$0xff]   ;;  %v2048_v49 = vld [vmem:[#allocation7 + $0xa4] ss:$16 sps:$4 sm:$0xff]  }
  0x5c   :  { %v2031_v50 = vld [vmem:[#allocation7 + $0x48] ss:$16 sps:$4 sm:$0xff]   ;;  %v2039_v51 = vld [vmem:[#allocation7 + $0x6c] ss:$16 sps:$4 sm:$0xff]   ;;  %v2046_v52 = vld [vmem:[#allocation7 + $0xa0] ss:$16 sps:$4 sm:$0xff]  }
  0x5d   :  { %v2054_v53 = vld [vmem:[#allocation7 + $0xc4] ss:$16 sps:$4 sm:$0xff]   ;;  %v2037_v54 = vld [vmem:[#allocation7 + $0x68] ss:$16 sps:$4 sm:$0xff]   ;;  %v2045_v55 = vld [vmem:[#allocation7 + $0x8c] ss:$16 sps:$4 sm:$0xff]  }
  0x5e   :  { %305 = vmatpush1.bf16.msra.mxu0 %v1982_v13  ;;  %346 = vmatpush1.bf16.msra.mxu1 %v2006_v26  ;;  %v2052_v56 = vld [vmem:[#allocation7 + $0xc0] ss:$16 sps:$4 sm:$0xff]   ;;  %v2060_v57 = vld [vmem:[#allocation7 + $0xe4] ss:$16 sps:$4 sm:$0xff]   ;;  %v2043_v58 = vld [vmem:[#allocation7 + $0x88] ss:$16 sps:$4 sm:$0xff]  }
  0x5f   :  { %306 = vmatprep.subr.bf16.mxu0 %v1983_v16  ;;  %347 = vmatprep.subr.bf16.mxu1 %v2007_v27  ;;  %v2051_v59 = vld [vmem:[#allocation7 + $0xac] ss:$16 sps:$4 sm:$0xff]   ;;  %v2058_v60 = vld [vmem:[#allocation7 + $0xe0] ss:$16 sps:$4 sm:$0xff]   ;;  %v2066_v61 = vld [vmem:[#allocation7 + $0x104] ss:$16 sps:$4 sm:$0xff]  }
  0x60   :  { %v2049_v62 = vld [vmem:[#allocation7 + $0xa8] ss:$16 sps:$4 sm:$0xff]   ;;  %v2057_v63 = vld [vmem:[#allocation7 + $0xcc] ss:$16 sps:$4 sm:$0xff]   ;;  %v2064_v0 = vld [vmem:[#allocation7 + $0x100] ss:$16 sps:$4 sm:$0xff]  }
  0x61   :  { %v2072_v1 = vld [vmem:[#allocation7 + $0x124] ss:$16 sps:$4 sm:$0xff]   ;;  %v2055_v2 = vld [vmem:[#allocation7 + $0xc8] ss:$16 sps:$4 sm:$0xff]   ;;  %v2063_v3 = vld [vmem:[#allocation7 + $0xec] ss:$16 sps:$4 sm:$0xff]  }
  0x62   :  { %307 = vmatpush1.bf16.msra.mxu0 %v1985_v17  ;;  %348 = vmatpush1.bf16.msra.mxu1 %v2009_v30  ;;  %v2070_v4 = vld [vmem:[#allocation7 + $0x120] ss:$16 sps:$4 sm:$0xff]   ;;  %v2078_v5 = vld [vmem:[#allocation7 + $0x144] ss:$16 sps:$4 sm:$0xff]   ;;  %v2061_v6 = vld [vmem:[#allocation7 + $0xe8] ss:$16 sps:$4 sm:$0xff]  }
  0x63   :  { %308 = vmatprep.subr.bf16.mxu0 %v1986_v20  ;;  %349 = vmatprep.subr.bf16.mxu1 %v2010_v31  ;;  %v2069_v7 = vld [vmem:[#allocation7 + $0x10c] ss:$16 sps:$4 sm:$0xff]   ;;  %v2076_v8 = vld [vmem:[#allocation7 + $0x140] ss:$16 sps:$4 sm:$0xff]   ;;  %v2084_v9 = vld [vmem:[#allocation7 + $0x164] ss:$16 sps:$4 sm:$0xff]  }
  0x64   :  { %v2067_v10 = vld [vmem:[#allocation7 + $0x108] ss:$16 sps:$4 sm:$0xff]   ;;  %v2075_v11 = vld [vmem:[#allocation7 + $0x12c] ss:$16 sps:$4 sm:$0xff]   ;;  %v2082_v12 = vld [vmem:[#allocation7 + $0x160] ss:$16 sps:$4 sm:$0xff]  }
  0x65   :  { %v2090_v13 = vld [vmem:[#allocation7 + $0x184] ss:$16 sps:$4 sm:$0xff]   ;;  %v2073_v14 = vld [vmem:[#allocation7 + $0x128] ss:$16 sps:$4 sm:$0xff]   ;;  %v2081_v15 = vld [vmem:[#allocation7 + $0x14c] ss:$16 sps:$4 sm:$0xff]  }
  0x66   :  { %309 = vmatpush1.bf16.msra.mxu0 %v1988_v21  ;;  %350 = vmatpush1.bf16.msra.mxu1 %v2012_v34  ;;  %v2088_v16 = vld [vmem:[#allocation7 + $0x180] ss:$16 sps:$4 sm:$0xff]   ;;  %v2096_v17 = vld [vmem:[#allocation7 + $0x1a4] ss:$16 sps:$4 sm:$0xff]   ;;  %v2079_v18 = vld [vmem:[#allocation7 + $0x148] ss:$16 sps:$4 sm:$0xff]  }
  0x67   :  { %310 = vmatprep.subr.bf16.mxu0 %v1989_v24  ;;  %351 = vmatprep.subr.bf16.mxu1 %v2013_v35  ;;  %v2087_v19 = vld [vmem:[#allocation7 + $0x16c] ss:$16 sps:$4 sm:$0xff]   ;;  %v2094_v20 = vld [vmem:[#allocation7 + $0x1a0] ss:$16 sps:$4 sm:$0xff]   ;;  %v2085_v21 = vld [vmem:[#allocation7 + $0x168] ss:$16 sps:$4 sm:$0xff]  }
  0x68   :  { %v2093_v22 = vld [vmem:[#allocation7 + $0x18c] ss:$16 sps:$4 sm:$0xff]   ;;  %v2091_v23 = vld [vmem:[#allocation7 + $0x188] ss:$16 sps:$4 sm:$0xff]   ;;  %v2102_v26 = vld [vmem:[#allocation7 + $0x1c4] ss:$16 sps:$4 sm:$0xff]  }
  0x69   :  { %v2099_v24 = vld [vmem:[#allocation7 + $0x1ac] ss:$16 sps:$4 sm:$0xff]   ;;  %v2108_v30 = vld [vmem:[#allocation7 + $0x1e4] ss:$16 sps:$4 sm:$0xff]   ;;  %s1698_s8 = sshll.u32 %s2367_s30, 4  ;;  %s1699_s8 = int_to_ptr.vmem [resolvable:$true] %s1698_s8 }
  0x6a   :  { %311 = vmatpush1.bf16.msra.mxu0 %v1991_v25  ;;  %352 = vmatpush1.bf16.msra.mxu1 %v2015_v38  ;;  %v2097_v25 = vld [vmem:[#allocation7 + $0x1a8] ss:$16 sps:$4 sm:$0xff]   ;;  %v2105_v27 = vld [vmem:[#allocation7 + $0x1cc] ss:$16 sps:$4 sm:$0xff]   ;;  %v2114_v34 = vld [vmem:[#allocation7 + $0x204] ss:$16 sps:$4 sm:$0xff]   ;;  %p2333_p5 = scmp.lt.s32.totalorder %s1699_s8, %s1699_s8 }
  0x6b   :  { %1176 = vmatprep.subr.bf16.mxu0 %v2018_v28  ;;  %1258 = vmatprep.subr.bf16.mxu1 %v2021_v39  ;;  %v2100_v28 = vld [vmem:[#allocation7 + $0x1c0] ss:$16 sps:$4 sm:$0xff]   ;;  %v2111_v31 = vld [vmem:[#allocation7 + $0x1ec] ss:$16 sps:$4 sm:$0xff]   ;;  %s2328_s9 = scalar_lea.vmem %s1699_s8, 32 }
  0x6c   :  { %v2117_v35 = vld [vmem:[#allocation7 + $0x20c] ss:$16 sps:$4 sm:$0xff]   ;;  %p2329_p4 = scmp.ne.s32.totalorder %s1699_s8, %s2328_s9  ;;  %p2334_p6 = scmp.lt.s32.totalorder %s2328_s9, %s2328_s9 }
  0x6d   :  { %329 = vmatmul.mubr.bf16.vlgmr.msra.gmra.mrb[0].mxu0 %v81_v29  ;;  %370 = vmatmul.mubr.bf16.vlgmr.msra.gmra.mrb[0].mxu1 %v81_v29  ;;  %v2103_v29 = vld [vmem:[#allocation7 + $0x1c8] ss:$16 sps:$4 sm:$0xff]   ;;  %v2468_v39 = vld [vmem:[%s2516_s2] sm:$0xf] }
  0x6e   :  { %1177 = vmatpush1.bf16.msra.mxu0 %v2016_v32  ;;  %1259 = vmatpush1.bf16.msra.mxu1 %v2019_v42  ;;  %v2106_v32 = vld [vmem:[#allocation7 + $0x1e0] ss:$16 sps:$4 sm:$0xff]   ;;  %p2335_p7 = por %p2334_p6, %p2333_p5 }
  0x6f   :  { %1178 = vmatprep.subr.bf16.mxu0 %v2024_v33  ;;  %1260 = vmatprep.subr.bf16.mxu1 %v2027_v43  ;;  %v2109_v33 = vld [vmem:[#allocation7 + $0x1e8] ss:$16 sps:$4 sm:$0xff]  }
  0x70   :  { %p2336_p8 = pnand %p2335_p7, %p2329_p4 }
  0x72   :  { %1179 = vmatpush1.bf16.msra.mxu0 %v2022_v36  ;;  %1261 = vmatpush1.bf16.msra.mxu1 %v2025_v46  ;;  %v116_v36 = vlaneseq }
  0x73   :  { %1180 = vmatprep.subr.bf16.mxu0 %v2030_v37  ;;  %1262 = vmatprep.subr.bf16.mxu1 %v2033_v47 }
  0x74   :  { %v2462_v37 = vshrl.u32 %v116_v36, 7  ;;  %v2174_v36 = vld [vmem:[#allocation7 + $0x344] ss:$16 sps:$4 sm:$0xff]  }
  0x76   :  { %1181 = vmatpush1.bf16.msra.mxu0 %v2028_v40  ;;  %1263 = vmatpush1.bf16.msra.mxu1 %v2031_v50  ;;  %v118_v38 = vsub.s32 0, %v2462_v37  ;;  %v122_v40 = vsub.s32 1, %v2462_v37 }
  0x77   :  { %1182 = vmatprep.subr.bf16.mxu0 %v2036_v41  ;;  %1264 = vmatprep.subr.bf16.mxu1 %v2039_v51  ;;  %v130_v51 = vsub.s32 3, %v2462_v37 }
  0x78   :  { %v119_v41 = vrot.slane %v2468_v39, %v118_v38  ;;  %v123_v42 = vrot.slane %v2468_v39, %v122_v40 }
  0x7a   :  { %1183 = vmatpush1.bf16.msra.mxu0 %v2034_v44  ;;  %1265 = vmatpush1.bf16.msra.mxu1 %v2037_v54  ;;  %v2115_v54 = vld [vmem:[#allocation7 + $0x208] ss:$16 sps:$4 sm:$0xff]  }
  0x7b   :  { %1184 = vmatprep.subr.bf16.mxu0 %v2042_v45  ;;  %1266 = vmatprep.subr.bf16.mxu1 %v2045_v55 }
  0x7e   :  { %1185 = vmatpush1.bf16.msra.mxu0 %v2040_v48  ;;  %1267 = vmatpush1.bf16.msra.mxu1 %v2043_v58  ;;  %v131_v58 = vrot.slane %v2468_v39, %v130_v51 }
  0x7f   :  { %1186 = vmatprep.subr.bf16.mxu0 %v2048_v49  ;;  %1268 = vmatprep.subr.bf16.mxu1 %v2051_v59  ;;  %v2118_v59 = vld [vmem:[#allocation7 + $0x220] ss:$16 sps:$4 sm:$0xff]  }
  0x82   :  { %1187 = vmatpush1.bf16.msra.mxu0 %v2046_v52  ;;  %1269 = vmatpush1.bf16.msra.mxu1 %v2049_v62  ;;  %v2129_v62 = vld [vmem:[#allocation7 + $0x24c] ss:$16 sps:$4 sm:$0xff]  }
  0x83   :  { %1188 = vmatprep.subr.bf16.mxu0 %v2054_v53  ;;  %1270 = vmatprep.subr.bf16.mxu1 %v2057_v63  ;;  %v2112_v53 = vld [vmem:[#allocation7 + $0x200] ss:$16 sps:$4 sm:$0xff]  }
  0x86   :  { %1189 = vmatpush1.bf16.msra.mxu0 %v2052_v56  ;;  %1271 = vmatpush1.bf16.msra.mxu1 %v2055_v2  ;;  %v2120_v56 = vld [vmem:[#allocation7 + $0x224] ss:$16 sps:$4 sm:$0xff]  }
  0x87   :  { %1190 = vmatprep.subr.bf16.mxu0 %v2060_v57  ;;  %1272 = vmatprep.subr.bf16.mxu1 %v2063_v3  ;;  %v2123_v57 = vld [vmem:[#allocation7 + $0x22c] ss:$16 sps:$4 sm:$0xff]   ;;  %v2124_v3 = vld [vmem:[#allocation7 + $0x240] ss:$16 sps:$4 sm:$0xff]  }
  0x8a   :  { %1191 = vmatpush1.bf16.msra.mxu0 %v2058_v60  ;;  %1273 = vmatpush1.bf16.msra.mxu1 %v2061_v6  ;;  %v2121_v60 = vld [vmem:[#allocation7 + $0x228] ss:$16 sps:$4 sm:$0xff]   ;;  %v2132_v6 = vld [vmem:[#allocation7 + $0x264] ss:$16 sps:$4 sm:$0xff]  }
  0x8b   :  { %1192 = vmatprep.subr.bf16.mxu0 %v2066_v61  ;;  %1274 = vmatprep.subr.bf16.mxu1 %v2069_v7  ;;  %v2126_v61 = vld [vmem:[#allocation7 + $0x244] ss:$16 sps:$4 sm:$0xff]   ;;  %v2135_v7 = vld [vmem:[#allocation7 + $0x26c] ss:$16 sps:$4 sm:$0xff]  }
  0x8e   :  { %1193 = vmatpush1.bf16.msra.mxu0 %v2064_v0  ;;  %1275 = vmatpush1.bf16.msra.mxu1 %v2067_v10  ;;  %v2130_v10 = vld [vmem:[#allocation7 + $0x260] ss:$16 sps:$4 sm:$0xff]  }
  0x8f   :  { %1194 = vmatprep.subr.bf16.mxu0 %v2072_v1  ;;  %1276 = vmatprep.subr.bf16.mxu1 %v2075_v11  ;;  %v2133_v11 = vld [vmem:[#allocation7 + $0x268] ss:$16 sps:$4 sm:$0xff]  }
  0x92   :  { %1195 = vmatpush1.bf16.msra.mxu0 %v2070_v4  ;;  %1277 = vmatpush1.bf16.msra.mxu1 %v2073_v14  ;;  %v2127_v4 = vld [vmem:[#allocation7 + $0x248] ss:$16 sps:$4 sm:$0xff]   ;;  %v2136_v14 = vld [vmem:[#allocation7 + $0x280] ss:$16 sps:$4 sm:$0xff]  }
  0x93   :  { %1196 = vmatprep.subr.bf16.mxu0 %v2078_v5  ;;  %1278 = vmatprep.subr.bf16.mxu1 %v2081_v15  ;;  %v2139_v15 = vld [vmem:[#allocation7 + $0x288] ss:$16 sps:$4 sm:$0xff]  }
  0x96   :  { %1197 = vmatpush1.bf16.msra.mxu0 %v2076_v8  ;;  %1279 = vmatpush1.bf16.msra.mxu1 %v2079_v18  ;;  %v2142_v18 = vld [vmem:[#allocation7 + $0x2a0] ss:$16 sps:$4 sm:$0xff]  }
  0x97   :  { %1198 = vmatprep.subr.bf16.mxu0 %v2084_v9  ;;  %1280 = vmatprep.subr.bf16.mxu1 %v2087_v19  ;;  %v2145_v19 = vld [vmem:[#allocation7 + $0x2a8] ss:$16 sps:$4 sm:$0xff]  }
  0x9a   :  { %1199 = vmatpush1.bf16.msra.mxu0 %v2082_v12  ;;  %1281 = vmatpush1.bf16.msra.mxu1 %v2085_v21  ;;  %v2138_v12 = vld [vmem:[#allocation7 + $0x284] ss:$16 sps:$4 sm:$0xff]   ;;  %v2153_v21 = vld [vmem:[#allocation7 + $0x2cc] ss:$16 sps:$4 sm:$0xff]  }
  0x9b   :  { %1200 = vmatprep.subr.bf16.mxu0 %v2090_v13  ;;  %1282 = vmatprep.subr.bf16.mxu1 %v2093_v22  ;;  %v2141_v13 = vld [vmem:[#allocation7 + $0x28c] ss:$16 sps:$4 sm:$0xff]   ;;  %v2148_v22 = vld [vmem:[#allocation7 + $0x2c0] ss:$16 sps:$4 sm:$0xff]  }
  0x9e   :  { %1201 = vmatpush1.bf16.msra.mxu0 %v2088_v16  ;;  %1283 = vmatpush1.bf16.msra.mxu1 %v2091_v23  ;;  %v2144_v16 = vld [vmem:[#allocation7 + $0x2a4] ss:$16 sps:$4 sm:$0xff]   ;;  %v2151_v23 = vld [vmem:[#allocation7 + $0x2c8] ss:$16 sps:$4 sm:$0xff]  }
  0x9f   :  { %1202 = vmatprep.subr.bf16.mxu0 %v2096_v17  ;;  %1284 = vmatprep.subr.bf16.mxu1 %v2099_v24  ;;  %v2147_v17 = vld [vmem:[#allocation7 + $0x2ac] ss:$16 sps:$4 sm:$0xff]   ;;  %v2156_v24 = vld [vmem:[#allocation7 + $0x2e4] ss:$16 sps:$4 sm:$0xff]  }
  0xa2   :  { %1203 = vmatpush1.bf16.msra.mxu0 %v2094_v20  ;;  %1285 = vmatpush1.bf16.msra.mxu1 %v2097_v25  ;;  %v2150_v20 = vld [vmem:[#allocation7 + $0x2c4] ss:$16 sps:$4 sm:$0xff]   ;;  %v2159_v25 = vld [vmem:[#allocation7 + $0x2ec] ss:$16 sps:$4 sm:$0xff]  }
  0xa3   :  { %1204 = vmatprep.subr.bf16.mxu0 %v2102_v26  ;;  %1286 = vmatprep.subr.bf16.mxu1 %v2105_v27  ;;  %v2154_v26 = vld [vmem:[#allocation7 + $0x2e0] ss:$16 sps:$4 sm:$0xff]   ;;  %v2157_v27 = vld [vmem:[#allocation7 + $0x2e8] ss:$16 sps:$4 sm:$0xff]  }
  0xa6   :  { %1205 = vmatpush1.bf16.msra.mxu0 %v2100_v28  ;;  %1287 = vmatpush1.bf16.msra.mxu1 %v2103_v29  ;;  %v2162_v28 = vld [vmem:[#allocation7 + $0x304] ss:$16 sps:$4 sm:$0xff]   ;;  %v2165_v29 = vld [vmem:[#allocation7 + $0x30c] ss:$16 sps:$4 sm:$0xff]  }
  0xa7   :  { %1206 = vmatprep.subr.bf16.mxu0 %v2108_v30  ;;  %1288 = vmatprep.subr.bf16.mxu1 %v2111_v31  ;;  %v2160_v30 = vld [vmem:[#allocation7 + $0x300] ss:$16 sps:$4 sm:$0xff]   ;;  %v2163_v31 = vld [vmem:[#allocation7 + $0x308] ss:$16 sps:$4 sm:$0xff]  }
  0xaa   :  { %1207 = vmatpush1.bf16.msra.mxu0 %v2106_v32  ;;  %1289 = vmatpush1.bf16.msra.mxu1 %v2109_v33  ;;  %v2168_v32 = vld [vmem:[#allocation7 + $0x324] ss:$16 sps:$4 sm:$0xff]   ;;  %v2171_v33 = vld [vmem:[#allocation7 + $0x32c] ss:$16 sps:$4 sm:$0xff]  }
  0xab   :  { %1217 = vmatprep.subr.bf16.mxu0 %v2114_v34  ;;  %1299 = vmatprep.subr.bf16.mxu1 %v2117_v35  ;;  %v2166_v34 = vld [vmem:[#allocation7 + $0x320] ss:$16 sps:$4 sm:$0xff]   ;;  %v2169_v35 = vld [vmem:[#allocation7 + $0x328] ss:$16 sps:$4 sm:$0xff]  }
 0x140   :  { %v330_v43 = vpop.f32.mrb[0].mxu0  ;;  %v2481_v63 = vpop.f32.mrb[0].mxu1 }
 0x141   :  { %v331_v44 = vadd.f32 %v330_v43, %v119_v41  ;;  %v332_v45 = vpop.f32.mrb[1].mxu0  ;;  %v373_v0 = vpop.f32.mrb[1].mxu1  ;;  %v2177_v41 = vld [vmem:[#allocation7 + $0x34c] ss:$16 sps:$4 sm:$0xff]   ;;  %v2175_v43 = vld [vmem:[#allocation7 + $0x348] ss:$16 sps:$4 sm:$0xff]  }
 0x142   :  { %v333_v46 = vadd.f32 %v332_v45, %v123_v42  ;;  %v334_v47 = vpop.f32.mrb[2].mxu0  ;;  %v374_v1 = vadd.f32 %v373_v0, %v131_v58  ;;  %v375_v2 = vpop.f32.mrb[2].mxu1  ;;  %v2172_v42 = vld [vmem:[#allocation7 + $0x340] ss:$16 sps:$4 sm:$0xff]   ;;  %v2183_v45 = vld [vmem:[#allocation7 + $0x36c] ss:$16 sps:$4 sm:$0xff]  }
 0x143   :  { %v378_v48 = vmax.f32 %v331_v44, 0.0  ;;  %v335_v49 = vpop.f32.mrb[3].mxu0  ;;  %v376_v5 = vpop.f32.mrb[3].mxu1  ;;  %v2180_v44 = vld [vmem:[#allocation7 + $0x364] ss:$16 sps:$4 sm:$0xff]  }
 0x144   :  { %v379_v50 = vmax.f32 %v333_v46, 0.0  ;;  %v381_v8 = vmax.f32 %v374_v1, 0.0  ;;  %v2178_v46 = vld [vmem:[#allocation7 + $0x360] ss:$16 sps:$4 sm:$0xff]   ;;  %v2181_v47 = vld [vmem:[#allocation7 + $0x368] ss:$16 sps:$4 sm:$0xff]  }
 0x145   :  { %v382_v55 = vpack.c.bf16 %v378_v48, %v378_v48  ;;  %v2186_v48 = vld [vmem:[#allocation7 + $0x384] ss:$16 sps:$4 sm:$0xff]   ;;  %v2189_v49 = vld [vmem:[#allocation7 + $0x38c] ss:$16 sps:$4 sm:$0xff]  }
 0x146   :  { %v383_v52 = vpack.c.bf16 %v379_v50, %v379_v50  ;;  %v385_v9 = vpack.c.bf16 %v381_v8, %v381_v8  ;;  %v2184_v50 = vld [vmem:[#allocation7 + $0x380] ss:$16 sps:$4 sm:$0xff]   ;;  %v2204_v1 = vld [vmem:[#allocation7 + $0x3e4] ss:$16 sps:$4 sm:$0xff]   ;;  %v2207_v2 = vld [vmem:[#allocation7 + $0x3ec] ss:$16 sps:$4 sm:$0xff]  }
 0x147   :  { %v2211_v8 = vld [vmem:[#allocation8 + $0x80] sm:$0xff]  }
 0x148   :  { %1208 = vmatprep.mubr.bf16.mxu0 %v383_v52  ;;  %1290 = vmatprep.mubr.bf16.mxu1 %v383_v52  ;;  %v2187_v52 = vld [vmem:[#allocation7 + $0x388] ss:$16 sps:$4 sm:$0xff]  }
 0x149   :  { %1209 = vmatmul.mubr.bf16.vlgmr.msra.gmra.mrb[4].mxu0 %v382_v55  ;;  %1291 = vmatmul.mubr.bf16.vlgmr.msra.gmra.mrb[4].mxu1 %v382_v55  ;;  %v2195_v55 = vld [vmem:[#allocation7 + $0x3ac] ss:$16 sps:$4 sm:$0xff]  }
 0x14a   :  { %1218 = vmatpush1.bf16.msra.mxu0 %v2112_v53  ;;  %1300 = vmatpush1.bf16.msra.mxu1 %v2115_v54  ;;  %v126_v53 = vsub.s32 2, %v2462_v37  ;;  %v2192_v54 = vld [vmem:[#allocation7 + $0x3a4] ss:$16 sps:$4 sm:$0xff]  }
 0x14b   :  { %1219 = vmatprep.subr.bf16.mxu0 %v2120_v56  ;;  %1301 = vmatprep.subr.bf16.mxu1 %v2123_v57  ;;  %v2190_v56 = vld [vmem:[#allocation7 + $0x3a0] ss:$16 sps:$4 sm:$0xff]   ;;  %v2193_v57 = vld [vmem:[#allocation7 + $0x3a8] ss:$16 sps:$4 sm:$0xff]  }
 0x14c   :  { %1249 = vmatprep.mubr.bf16.mxu0 %v385_v9  ;;  %1331 = vmatprep.mubr.bf16.mxu1 %v385_v9  ;;  %v127_v58 = vrot.slane %v2468_v39, %v126_v53  ;;  %v2208_v39 = vld [vmem:[#allocation8 + $0x40] sm:$0xff]  }
 0x14e   :  { %1220 = vmatpush1.bf16.msra.mxu0 %v2118_v59  ;;  %1302 = vmatpush1.bf16.msra.mxu1 %v2121_v60  ;;  %v2198_v59 = vld [vmem:[#allocation7 + $0x3c4] ss:$16 sps:$4 sm:$0xff]   ;;  %v2201_v60 = vld [vmem:[#allocation7 + $0x3cc] ss:$16 sps:$4 sm:$0xff]   ;;  %v372_v0 = vadd.f32 %v2481_v63, %v127_v58 }
 0x14f   :  { %1221 = vmatprep.subr.bf16.mxu0 %v2126_v61  ;;  %1303 = vmatprep.subr.bf16.mxu1 %v2129_v62  ;;  %v2196_v61 = vld [vmem:[#allocation7 + $0x3c0] ss:$16 sps:$4 sm:$0xff]   ;;  %v2199_v62 = vld [vmem:[#allocation7 + $0x3c8] ss:$16 sps:$4 sm:$0xff]  }
 0x150   :  { %v380_v5 = vmax.f32 %v372_v0, 0.0  ;;  %v2212_v63 = vld [vmem:[#allocation8 + $0x48] sm:$0xff]  }
 0x152   :  { %1222 = vmatpush1.bf16.msra.mxu0 %v2124_v3  ;;  %1304 = vmatpush1.bf16.msra.mxu1 %v2127_v4  ;;  %v2202_v3 = vld [vmem:[#allocation7 + $0x3e0] ss:$16 sps:$4 sm:$0xff]   ;;  %v2205_v4 = vld [vmem:[#allocation7 + $0x3e8] ss:$16 sps:$4 sm:$0xff]   ;;  %v384_v9 = vpack.c.bf16 %v380_v5, %v380_v5 }
 0x153   :  { %1223 = vmatprep.subr.bf16.mxu0 %v2132_v6  ;;  %1305 = vmatprep.subr.bf16.mxu1 %v2135_v7  ;;  %v2209_v6 = vld [vmem:[#allocation8 + $0xc0] sm:$0xff]  }
 0x154   :  { %v2210_v7 = vld [vmem:[#allocation8] sm:$0xff]  }
 0x156   :  { %1224 = vmatpush1.bf16.msra.mxu0 %v2130_v10  ;;  %1306 = vmatpush1.bf16.msra.mxu1 %v2133_v11  ;;  %v2213_v10 = vld [vmem:[#allocation8 + $0xc8] sm:$0xff]  }
 0x157   :  { %1225 = vmatprep.subr.bf16.mxu0 %v2138_v12  ;;  %1307 = vmatprep.subr.bf16.mxu1 %v2141_v13  ;;  %v2214_v11 = vld [vmem:[#allocation8 + $0x8] sm:$0xff]   ;;  %v2216_v13 = vld [vmem:[#allocation8 + $0x50] sm:$0xff]  }
 0x158   :  { %v2215_v12 = vld [vmem:[#allocation8 + $0x88] sm:$0xff]  }
 0x15a   :  { %1226 = vmatpush1.bf16.msra.mxu0 %v2136_v14  ;;  %1308 = vmatpush1.bf16.msra.mxu1 %v2139_v15  ;;  %v2217_v14 = vld [vmem:[#allocation8 + $0xd0] sm:$0xff]  }
 0x15b   :  { %1227 = vmatprep.subr.bf16.mxu0 %v2144_v16  ;;  %1309 = vmatprep.subr.bf16.mxu1 %v2147_v17  ;;  %v2218_v15 = vld [vmem:[#allocation8 + $0x10] sm:$0xff]   ;;  %v2220_v17 = vld [vmem:[#allocation8 + $0x58] sm:$0xff]  }
 0x15c   :  { %v2219_v16 = vld [vmem:[#allocation8 + $0x90] sm:$0xff]  }
 0x15e   :  { %1228 = vmatpush1.bf16.msra.mxu0 %v2142_v18  ;;  %1310 = vmatpush1.bf16.msra.mxu1 %v2145_v19  ;;  %v2221_v18 = vld [vmem:[#allocation8 + $0xd8] sm:$0xff]  }
 0x15f   :  { %1229 = vmatprep.subr.bf16.mxu0 %v2150_v20  ;;  %1311 = vmatprep.subr.bf16.mxu1 %v2153_v21  ;;  %v2222_v19 = vld [vmem:[#allocation8 + $0x18] sm:$0xff]   ;;  %v2224_v21 = vld [vmem:[#allocation8 + $0x60] sm:$0xff]  }
 0x160   :  { %v2223_v20 = vld [vmem:[#allocation8 + $0x98] sm:$0xff]  }
 0x162   :  { %1230 = vmatpush1.bf16.msra.mxu0 %v2148_v22  ;;  %1312 = vmatpush1.bf16.msra.mxu1 %v2151_v23  ;;  %v2225_v22 = vld [vmem:[#allocation8 + $0xe0] sm:$0xff]  }
 0x163   :  { %1231 = vmatprep.subr.bf16.mxu0 %v2156_v24  ;;  %1313 = vmatprep.subr.bf16.mxu1 %v2159_v25  ;;  %v2226_v23 = vld [vmem:[#allocation8 + $0x20] sm:$0xff]   ;;  %v2228_v25 = vld [vmem:[#allocation8 + $0x68] sm:$0xff]  }
 0x164   :  { %v2227_v24 = vld [vmem:[#allocation8 + $0xa0] sm:$0xff]  }
 0x166   :  { %1232 = vmatpush1.bf16.msra.mxu0 %v2154_v26  ;;  %1314 = vmatpush1.bf16.msra.mxu1 %v2157_v27  ;;  %v2229_v26 = vld [vmem:[#allocation8 + $0xe8] sm:$0xff]  }
 0x167   :  { %1233 = vmatprep.subr.bf16.mxu0 %v2162_v28  ;;  %1315 = vmatprep.subr.bf16.mxu1 %v2165_v29  ;;  %v2230_v27 = vld [vmem:[#allocation8 + $0x28] sm:$0xff]   ;;  %v2232_v29 = vld [vmem:[#allocation8 + $0x70] sm:$0xff]  }
 0x168   :  { %v2231_v28 = vld [vmem:[#allocation8 + $0xa8] sm:$0xff]  }
 0x16a   :  { %1234 = vmatpush1.bf16.msra.mxu0 %v2160_v30  ;;  %1316 = vmatpush1.bf16.msra.mxu1 %v2163_v31  ;;  %v2233_v30 = vld [vmem:[#allocation8 + $0xf0] sm:$0xff]  }
 0x16b   :  { %1235 = vmatprep.subr.bf16.mxu0 %v2168_v32  ;;  %1317 = vmatprep.subr.bf16.mxu1 %v2171_v33  ;;  %v2234_v31 = vld [vmem:[#allocation8 + $0x30] sm:$0xff]   ;;  %v2236_v33 = vld [vmem:[#allocation8 + $0x78] sm:$0xff]  }
 0x16c   :  { %v2235_v32 = vld [vmem:[#allocation8 + $0xb0] sm:$0xff]  }
 0x16e   :  { %1236 = vmatpush1.bf16.msra.mxu0 %v2166_v34  ;;  %1318 = vmatpush1.bf16.msra.mxu1 %v2169_v35  ;;  %v2237_v34 = vld [vmem:[#allocation8 + $0xf8] sm:$0xff]  }
 0x16f   :  { %1237 = vmatprep.subr.bf16.mxu0 %v2174_v36  ;;  %1319 = vmatprep.subr.bf16.mxu1 %v2177_v41  ;;  %v2238_v35 = vld [vmem:[#allocation8 + $0x38] sm:$0xff]   ;;  %v514_v41 = vld [vmem:[%s2518_s4] sm:$0xf] }
 0x170   :  { %v2239_v36 = vld [vmem:[#allocation8 + $0xb8] sm:$0xff]  }
 0x172   :  { %1238 = vmatpush1.bf16.msra.mxu0 %v2172_v42  ;;  %1320 = vmatpush1.bf16.msra.mxu1 %v2175_v43  ;;  %v519_v42 = vrot.slane %v514_v41, %v118_v38  ;;  %v527_v43 = vrot.slane %v514_v41, %v126_v53 }
 0x173   :  { %1239 = vmatprep.subr.bf16.mxu0 %v2180_v44  ;;  %1321 = vmatprep.subr.bf16.mxu1 %v2183_v45  ;;  %v523_v44 = vrot.slane %v514_v41, %v122_v40  ;;  %v531_v45 = vrot.slane %v514_v41, %v130_v51 }
 0x176   :  { %1240 = vmatpush1.bf16.msra.mxu0 %v2178_v46  ;;  %1322 = vmatpush1.bf16.msra.mxu1 %v2181_v47 }
 0x177   :  { %1241 = vmatprep.subr.bf16.mxu0 %v2186_v48  ;;  %1323 = vmatprep.subr.bf16.mxu1 %v2189_v49 }
 0x17a   :  { %1242 = vmatpush1.bf16.msra.mxu0 %v2184_v50  ;;  %1324 = vmatpush1.bf16.msra.mxu1 %v2187_v52 }
 0x17b   :  { %1243 = vmatprep.subr.bf16.mxu0 %v2192_v54  ;;  %1325 = vmatprep.subr.bf16.mxu1 %v2195_v55 }
 0x17e   :  { %1244 = vmatpush1.bf16.msra.mxu0 %v2190_v56  ;;  %1326 = vmatpush1.bf16.msra.mxu1 %v2193_v57 }
 0x17f   :  { %1245 = vmatprep.subr.bf16.mxu0 %v2198_v59  ;;  %1327 = vmatprep.subr.bf16.mxu1 %v2201_v60 }
 0x182   :  { %1246 = vmatpush1.bf16.msra.mxu0 %v2196_v61  ;;  %1328 = vmatpush1.bf16.msra.mxu1 %v2199_v62 }
 0x183   :  { %1247 = vmatprep.subr.bf16.mxu0 %v2204_v1  ;;  %1329 = vmatprep.subr.bf16.mxu1 %v2207_v2  ;;  %v1869_v2 = vld [vmem:[%s2520_s6] ss:$0 sm:$0xff] }
 0x186   :  { %1248 = vmatpush1.bf16.msra.mxu0 %v2202_v3  ;;  %1330 = vmatpush1.bf16.msra.mxu1 %v2205_v4 }
 0x187   :  { %1902 = vmatprep.subr.bf16.mxu0 %v2208_v39  ;;  %1924 = vmatprep.subr.bf16.mxu1 %v2209_v6 }
 0x189   :  { %1250 = vmatmul.mubr.bf16.vlgmr.msra.gmra.mrb[4].mxu0 %v384_v9  ;;  %1332 = vmatmul.mubr.bf16.vlgmr.msra.gmra.mrb[4].mxu1 %v384_v9 }
 0x18a   :  { %1903 = vmatpush3.bf16.msra.mxu0 %v2210_v7  ;;  %1925 = vmatpush3.bf16.msra.mxu1 %v2211_v8 }
 0x18b   :  { %1904 = vmatprep.subr.bf16.mxu0 %v2212_v63  ;;  %1926 = vmatprep.subr.bf16.mxu1 %v2213_v10 }
 0x18e   :  { %1905 = vmatpush3.bf16.msra.mxu0 %v2214_v11  ;;  %1927 = vmatpush3.bf16.msra.mxu1 %v2215_v12 }
 0x18f   :  { %1906 = vmatprep.subr.bf16.mxu0 %v2216_v13  ;;  %1928 = vmatprep.subr.bf16.mxu1 %v2217_v14 }
 0x192   :  { %1907 = vmatpush3.bf16.msra.mxu0 %v2218_v15  ;;  %1929 = vmatpush3.bf16.msra.mxu1 %v2219_v16 }
 0x193   :  { %1908 = vmatprep.subr.bf16.mxu0 %v2220_v17  ;;  %1930 = vmatprep.subr.bf16.mxu1 %v2221_v18 }
 0x196   :  { %1909 = vmatpush3.bf16.msra.mxu0 %v2222_v19  ;;  %1931 = vmatpush3.bf16.msra.mxu1 %v2223_v20 }
 0x197   :  { %1910 = vmatprep.subr.bf16.mxu0 %v2224_v21  ;;  %1932 = vmatprep.subr.bf16.mxu1 %v2225_v22 }
 0x19a   :  { %1911 = vmatpush3.bf16.msra.mxu0 %v2226_v23  ;;  %1933 = vmatpush3.bf16.msra.mxu1 %v2227_v24 }
 0x19b   :  { %1912 = vmatprep.subr.bf16.mxu0 %v2228_v25  ;;  %1934 = vmatprep.subr.bf16.mxu1 %v2229_v26 }
 0x19e   :  { %1913 = vmatpush3.bf16.msra.mxu0 %v2230_v27  ;;  %1935 = vmatpush3.bf16.msra.mxu1 %v2231_v28 }
 0x19f   :  { %1914 = vmatprep.subr.bf16.mxu0 %v2232_v29  ;;  %1936 = vmatprep.subr.bf16.mxu1 %v2233_v30 }
 0x1a2   :  { %1915 = vmatpush3.bf16.msra.mxu0 %v2234_v31  ;;  %1937 = vmatpush3.bf16.msra.mxu1 %v2235_v32 }
 0x1a3   :  { %1916 = vmatprep.subr.bf16.mxu0 %v2236_v33  ;;  %1938 = vmatprep.subr.bf16.mxu1 %v2237_v34 }
 0x1a6   :  { %1917 = vmatpush3.bf16.msra.mxu0 %v2238_v35  ;;  %1939 = vmatpush3.bf16.msra.mxu1 %v2239_v36 }
 0x25c   :  { %v1251_v46 = vpop.f32.mrb[4].mxu0  ;;  %v1333_v47 = vpop.f32.mrb[4].mxu1 }
 0x25d   :  { %v1946_v48 = vadd.f32 %v1251_v46, %v519_v42  ;;  %v1948_v49 = vadd.f32 %v1333_v47, %v527_v43  ;;  %v1253_v50 = vpop.f32.mrb[5].mxu0  ;;  %v1335_v52 = vpop.f32.mrb[5].mxu1 }
 0x25e   :  { %v1947_v54 = vadd.f32 %v1253_v50, %v523_v44  ;;  %v1949_v55 = vadd.f32 %v1335_v52, %v531_v45  ;;  %v1255_v56 = vpop.f32.mrb[6].mxu0  ;;  %v1337_v57 = vpop.f32.mrb[6].mxu1 }
 0x25f   :  { %v1340_v38 = vmax.f32 %v1946_v48, 0.0  ;;  %v1342_v58 = vmax.f32 %v1948_v49, 0.0  ;;  %v1256_v59 = vpop.f32.mrb[7].mxu0  ;;  %v1338_v53 = vpop.f32.mrb[7].mxu1 }
 0x260   :  { %v1341_v60 = vmax.f32 %v1947_v54, 0.0  ;;  %v1343_v61 = vmax.f32 %v1949_v55, 0.0 }
 0x261   :  { %v1344_v37 = vpack.c.bf16 %v1340_v38, %v1340_v38  ;;  %v1346_v51 = vpack.c.bf16 %v1342_v58, %v1342_v58 }
 0x262   :  { %v1345_v40 = vpack.c.bf16 %v1341_v60, %v1341_v60  ;;  %v1347_v62 = vpack.c.bf16 %v1343_v61, %v1343_v61 }
 0x264   :  { %1643 = vmatprep.mubr.bf16.mxu0 %v1345_v40  ;;  %1683 = vmatprep.mubr.bf16.mxu1 %v1347_v62 }
 0x265   :  { %1644 = vmatmul.mubr.bf16.vlgmr.msra.gmra.mrb[8].mxu0 %v1344_v37  ;;  %1684 = vmatmul.mubr.bf16.vlgmr.msra.gmra.mrb[8].mxu1 %v1346_v51 }
 0x338   :  { %v1918_v0 = vpop.f32.mrb[8].mxu0  ;;  %v1940_v1 = vpop.f32.mrb[8].mxu1 }
 0x339   :  { %v1919_v3 = vpop.f32.mrb[9].mxu0  ;;  %v1941_v4 = vpop.f32.mrb[9].mxu1 }
 0x33a   :  { %v1920_v5 = vadd.f32 %v1919_v3, %v1918_v0  ;;  %v1942_v39 = vadd.f32 %v1941_v4, %v1940_v1  ;;  %v1921_v6 = vpop.f32.mrb[10].mxu0  ;;  %v1943_v7 = vpop.f32.mrb[10].mxu1 }
 0x33b   :  { %v1922_v8 = vpop.f32.mrb[11].mxu0  ;;  %v1944_v9 = vpop.f32.mrb[11].mxu1 }
 0x33c   :  { %v1646_v63 = vadd.f32 %v1920_v5, %v1869_v2 }
 0x33e   :  { %v1686_v10 = vadd.f32 %v1942_v39, %v1646_v63 }
 0x340   :  { %1691 = vst [vmem:[#allocation10] sm:$0x3] %v1686_v10 }
 0x341   :  { %2339 = shalt.err (!%p2336_p8)
}
 0x342   :  { %s2340_s13 = scalar_lea.hbm %s2521_s7, 32 }
 0x343   :  { %p2341_p9 = scmp.ne.s32.totalorder %s2521_s7, %s2340_s13  ;;  %p2344_p10 = scmp.lt.u32.totalorder %s2340_s13, %s2521_s7 }
 0x345   :  { %p2346_p11 = pnand %p2344_p10, %p2341_p9 }
 0x347   :  { %2349 = shalt.err (!%p2346_p11)
}
 0x348   :  { %1701 = dma.vmem_to_hbm [thread:$0]  %s1699_s8, 32, %s2521_s7, [#allocation4]  }
 0x349   :  { %2356 = dma.done.wait [#allocation4], 32  }
 0x34a   :  { %2357 = vsyncadd [#allocation4], 4294967264 }
 0x34b   :  { %1705 = vsyncpa [#allocation3], 1 }
 0x34c   :  { %1706 = vsyncpa [#allocation6], 1 }
 0x34d   :  { %1707 = vsyncpa [#allocation9], 1 }
 0x34e   :  { %1708 = vsyncpa [#allocation4], 1 }

</bundles_post_ra>
